<compile_context>
chip_gen: v7x
topology: tpu7x:2x2x1
jax: 0.10.0
libtpu: 0.0.40
codegen_flags: <defaults>
</compile_context>

<pallas_src>
import functools

import jax
import jax.numpy as jnp
from jax.experimental import pallas as pl
from jax.experimental.pallas import tpu as pltpu

LANE = 128


def _round_up(n, m):
    return ((n + m - 1) // m) * m


def mlp_kernel(x_ref, w1_ref, b1_ref, w2_ref, b2_ref, o_ref):
    # x streams from HBM as f32; cast to bf16 in-register just before the MXU.
    x = x_ref[...].astype(jnp.bfloat16)
    # layer 1: bf16 x bf16 -> f32 accumulator
    h = jnp.dot(x, w1_ref[...], preferred_element_type=jnp.float32)
    # f32 epilogue: bias + ReLU (b1 is (1, H_pad), broadcasts over batch rows)
    h = jnp.maximum(h + b1_ref[...], 0.0)
    # layer 2: downcast activations to bf16 for the MXU, accumulate in f32
    out = jnp.dot(h.astype(jnp.bfloat16), w2_ref[...],
                  preferred_element_type=jnp.float32)
    out = out + b2_ref[...]                      # b2 is (1, C_pad)
    o_ref[...] = out.astype(o_ref.dtype)         # bf16 store (lane-dense, unmasked)


def pad_params(w1, b1, w2, b2):
    """One-time lane-padding + bf16 cast of the parameters (cache the result).

    Weights are stored [in_features, out_features] (transpose of nn.Linear's
    weight) so the kernel computes x @ W + b, matching the PyTorch forward.
    """
    K, H = w1.shape
    C = w2.shape[1]
    H_pad = _round_up(max(H, LANE), LANE)
    C_pad = _round_up(max(C, LANE), LANE)
    w1p = jnp.zeros((K, H_pad), jnp.bfloat16).at[:, :H].set(w1.astype(jnp.bfloat16))
    b1p = jnp.zeros((1, H_pad), jnp.float32).at[:, :H].set(
        jnp.asarray(b1, jnp.float32).reshape(1, H))
    w2p = jnp.zeros((H_pad, C_pad), jnp.bfloat16).at[:H, :C].set(w2.astype(jnp.bfloat16))
    b2p = jnp.zeros((1, C_pad), jnp.float32).at[:, :C].set(
        jnp.asarray(b2, jnp.float32).reshape(1, C))
    return w1p, b1p, w2p, b2p


def _resident_spec(shape, single_buffer):
    """BlockSpec for a block that never changes across grid steps."""
    idx = lambda i: (0, 0)
    if single_buffer:
        try:
            # Constant blocks don't need double buffering; halves their VMEM.
            return pl.BlockSpec(shape, idx, pipeline_mode=pl.Buffered(1))
        except TypeError:
            pass  # older API without pipeline_mode kwarg -> default buffering
    return pl.BlockSpec(shape, idx)


@functools.partial(jax.jit,
                   static_argnames=("num_classes", "tb_max", "single_buffer_weights"))
def mlp_forward(x, w1p, b1p, w2p, b2p, *, num_classes, tb_max=512,
                single_buffer_weights=True):
    """x: [B, K] f32; padded params from pad_params(). Returns [B, num_classes] f32."""
    B, K = x.shape
    H_pad = w1p.shape[1]
    C_pad = w2p.shape[1]

    # Batch tile: multiple of 16 (packed bf16 sublane tile for the output
    # store), big enough to amortize the ~0.35 us per-grid-step overhead.
    TB = min(_round_up(B, 16), tb_max)
    # Give v7x's two TensorCores >=2 grid steps when the batch allows it.
    if B >= 32 and _round_up(B, TB) // TB < 2:
        TB = _round_up(TB // 2, 16)
    B_pad = _round_up(B, TB)
    if B_pad != B:
        x = jnp.pad(x, ((0, B_pad - B), (0, 0)))  # only the ragged tail rows

    grid = (B_pad // TB,)

    # VMEM budget: resident weights/biases + double-buffered x / out tiles.
    # TODO(synk): once resident weights outgrow the scoped VMEM budget
    # (v7x 64 MiB physical / v5e 16 MiB default), add a K (or H) reduction
    # grid axis marked "arbitrary" with an f32 VMEM accumulator instead of
    # keeping both weights fully resident.
    weight_bytes = (w1p.size + w2p.size) * 2 + (b1p.size + b2p.size) * 4
    if not single_buffer_weights:
        weight_bytes *= 2
    tile_bytes = 2 * TB * K * 4 + 2 * TB * C_pad * 2
    vmem_limit = int(min(max(2 * (weight_bytes + tile_bytes) + (4 << 20), 16 << 20),
                         64 << 20))

    flops = 2 * B_pad * (K * H_pad + H_pad * C_pad)
    bytes_accessed = (B_pad * K * 4 + w1p.size * 2 + w2p.size * 2
                      + b1p.size * 4 + b2p.size * 4 + B_pad * C_pad * 2)

    # NOTE: K (=num_input) equals the full array dim so the (TB, K) x block is
    # legal even when K < 128.  For production-sized K, pad/tile K to a
    # multiple of 128 for unmasked loads and full MXU contraction width.
    out = pl.pallas_call(
        mlp_kernel,
        out_shape=jax.ShapeDtypeStruct((B_pad, C_pad), jnp.bfloat16),
        grid_spec=pltpu.PrefetchScalarGridSpec(
            num_scalar_prefetch=0,
            grid=grid,
            in_specs=[
                pl.BlockSpec((TB, K), lambda i: (i, 0)),                # x: batch-tiled f32
                _resident_spec((K, H_pad), single_buffer_weights),      # w1 (VMEM-resident)
                _resident_spec((1, H_pad), single_buffer_weights),      # b1
                _resident_spec((H_pad, C_pad), single_buffer_weights),  # w2
                _resident_spec((1, C_pad), single_buffer_weights),      # b2
            ],
            out_specs=pl.BlockSpec((TB, C_pad), lambda i: (i, 0)),
        ),
        compiler_params=pltpu.CompilerParams(
            dimension_semantics=("parallel",),   # batch tiles shard over v7x's 2 TCs
            vmem_limit_bytes=vmem_limit,
        ),
        cost_estimate=pl.CostEstimate(
            flops=flops, transcendentals=0, bytes_accessed=bytes_accessed),
    )(x, w1p, b1p, w2p, b2p)

    return out[:B, :num_classes].astype(jnp.float32)


if __name__ == "__main__":
    # Shapes implied by the module: num_input features -> hidden1 -> num_classes=2
    batch = 8
    num_input = 32
    hidden1_size = 64
    num_classes = 2

    key = jax.random.PRNGKey(0)
    kx, kw1, kb1, kw2, kb2 = jax.random.split(key, 5)

    x = jax.random.normal(kx, (batch, num_input), dtype=jnp.float32)

    # Deterministic parameter init (uniform like PyTorch's default Linear init)
    bound1 = num_input ** -0.5
    w1 = jax.random.uniform(kw1, (num_input, hidden1_size),
                            minval=-bound1, maxval=bound1, dtype=jnp.float32)
    b1 = jax.random.uniform(kb1, (hidden1_size,),
                            minval=-bound1, maxval=bound1, dtype=jnp.float32)

    bound2 = hidden1_size ** -0.5
    w2 = jax.random.uniform(kw2, (hidden1_size, num_classes),
                            minval=-bound2, maxval=bound2, dtype=jnp.float32)
    b2 = jax.random.uniform(kb2, (num_classes,),
                            minval=-bound2, maxval=bound2, dtype=jnp.float32)

    # One-time padded/bf16 parameter cache (not paid per forward call).
    w1p, b1p, w2p, b2p = pad_params(w1, b1, w2, b2)

    try:
        out = jax.block_until_ready(
            mlp_forward(x, w1p, b1p, w2p, b2p, num_classes=num_classes))
    except Exception:
        # Fallback if this JAX build rejects single-buffered constant blocks.
        out = jax.block_until_ready(
            mlp_forward(x, w1p, b1p, w2p, b2p, num_classes=num_classes,
                        single_buffer_weights=False))

    # Reference check in plain JAX (same semantics as the PyTorch forward).
    # Tolerance accounts for bf16 MXU operands and the bf16 output store.
    ref = jnp.maximum(x @ w1 + b1[None, :], 0.0) @ w2 + b2[None, :]
    assert out.shape == (batch, num_classes)
    assert jnp.allclose(out, ref, atol=2e-2, rtol=2e-2), (
        f"max abs err {jnp.max(jnp.abs(out - ref))}")

    print("KERNEL_OK")
</pallas_src>

<mosaic_0001>
module attributes {stable_mosaic.version = 11 : i64} {
  func.func @mlp_kernel(%arg0: i32, %arg1: memref<16x32xf32, #tpu.memory_space<vmem>>, %arg2: memref<32x128xbf16, #tpu.memory_space<vmem>>, %arg3: memref<1x128xf32, #tpu.memory_space<vmem>>, %arg4: memref<128x128xbf16, #tpu.memory_space<vmem>>, %arg5: memref<1x128xf32, #tpu.memory_space<vmem>>, %arg6: memref<16x128xbf16, #tpu.memory_space<vmem>>) attributes {dimension_semantics = [#tpu.dimension_semantics<parallel>], iteration_bounds = array<i64: 1>, scalar_prefetch = 0 : i64, scratch_operands = 0 : i64, tpu.core_type = #tpu.core_type<tc>, window_params = [{transform_indices = @transform_0, window_bounds = array<i64: 16, 32>}, {pipeline_mode = #tpu.pipeline_mode<synchronous>, transform_indices = @transform_1, window_bounds = array<i64: 32, 128>}, {pipeline_mode = #tpu.pipeline_mode<synchronous>, transform_indices = @transform_2, window_bounds = array<i64: 1, 128>}, {pipeline_mode = #tpu.pipeline_mode<synchronous>, transform_indices = @transform_3, window_bounds = array<i64: 128, 128>}, {pipeline_mode = #tpu.pipeline_mode<synchronous>, transform_indices = @transform_4, window_bounds = array<i64: 1, 128>}, {transform_indices = @transform_5, window_bounds = array<i64: 16, 128>}]} {
    %c0 = arith.constant 0 : index
    %c0_0 = arith.constant 0 : index
    %0 = vector.load %arg1[%c0, %c0_0] : memref<16x32xf32, #tpu.memory_space<vmem>>, vector<16x32xf32>
    %1 = arith.truncf %0 : vector<16x32xf32> to vector<16x32xbf16>
    %c0_1 = arith.constant 0 : index
    %c0_2 = arith.constant 0 : index
    %2 = vector.load %arg2[%c0_1, %c0_2] : memref<32x128xbf16, #tpu.memory_space<vmem>>, vector<32x128xbf16>
    %cst = arith.constant dense<0.000000e+00> : vector<16x128xf32>
    %3 = tpu.matmul %1, %2, %cst {dimension_numbers = #tpu.dot_dimension_numbers<[1], [0], [0], [1], [0, 0, 1, 1], [], []>} : vector<16x32xbf16>, vector<32x128xbf16>, vector<16x128xf32> -> vector<16x128xf32>
    %c0_3 = arith.constant 0 : index
    %c0_4 = arith.constant 0 : index
    %4 = vector.load %arg3[%c0_3, %c0_4] : memref<1x128xf32, #tpu.memory_space<vmem>>, vector<1x128xf32>
    %5 = vector.broadcast %4 : vector<1x128xf32> to vector<16x128xf32>
    %6 = arith.addf %3, %5 : vector<16x128xf32>
    %cst_5 = arith.constant 0.000000e+00 : f32
    %7 = vector.broadcast %cst_5 : f32 to vector<16x128xf32>
    %8 = arith.maximumf %6, %7 : vector<16x128xf32>
    %9 = arith.truncf %8 : vector<16x128xf32> to vector<16x128xbf16>
    %c0_6 = arith.constant 0 : index
    %c0_7 = arith.constant 0 : index
    %10 = vector.load %arg4[%c0_6, %c0_7] : memref<128x128xbf16, #tpu.memory_space<vmem>>, vector<128x128xbf16>
    %cst_8 = arith.constant dense<0.000000e+00> : vector<16x128xf32>
    %11 = tpu.matmul %9, %10, %cst_8 {dimension_numbers = #tpu.dot_dimension_numbers<[1], [0], [0], [1], [0, 0, 1, 1], [], []>} : vector<16x128xbf16>, vector<128x128xbf16>, vector<16x128xf32> -> vector<16x128xf32>
    %c0_9 = arith.constant 0 : index
    %c0_10 = arith.constant 0 : index
    %12 = vector.load %arg5[%c0_9, %c0_10] : memref<1x128xf32, #tpu.memory_space<vmem>>, vector<1x128xf32>
    %13 = vector.broadcast %12 : vector<1x128xf32> to vector<16x128xf32>
    %14 = arith.addf %11, %13 : vector<16x128xf32>
    %15 = arith.truncf %14 : vector<16x128xf32> to vector<16x128xbf16>
    %c0_11 = arith.constant 0 : index
    %c0_12 = arith.constant 0 : index
    %16 = vector.load %arg6[%c0_11, %c0_12] : memref<16x128xbf16, #tpu.memory_space<vmem>>, vector<16x128xbf16>
    tpu.vector_store %arg6[%c0_11, %c0_12], %15 {strides = array<i32>} : memref<16x128xbf16, #tpu.memory_space<vmem>>, vector<16x128xbf16>,
    return
  }
  func.func @transform_0(%arg0: i32) -> (i32, i32) {
    %c0_i32 = arith.constant 0 : i32
    %c0_i32_0 = arith.constant 0 : i32
    return %arg0, %c0_i32 : i32, i32
  }
  func.func @transform_1(%arg0: i32) -> (i32, i32) {
    %c0_i32 = arith.constant 0 : i32
    %c0_i32_0 = arith.constant 0 : i32
    %c0_i32_1 = arith.constant 0 : i32
    return %c0_i32, %c0_i32_0 : i32, i32
  }
  func.func @transform_2(%arg0: i32) -> (i32, i32) {
    %c0_i32 = arith.constant 0 : i32
    %c0_i32_0 = arith.constant 0 : i32
    %c0_i32_1 = arith.constant 0 : i32
    return %c0_i32, %c0_i32_0 : i32, i32
  }
  func.func @transform_3(%arg0: i32) -> (i32, i32) {
    %c0_i32 = arith.constant 0 : i32
    %c0_i32_0 = arith.constant 0 : i32
    %c0_i32_1 = arith.constant 0 : i32
    return %c0_i32, %c0_i32_0 : i32, i32
  }
  func.func @transform_4(%arg0: i32) -> (i32, i32) {
    %c0_i32 = arith.constant 0 : i32
    %c0_i32_0 = arith.constant 0 : i32
    %c0_i32_1 = arith.constant 0 : i32
    return %c0_i32, %c0_i32_0 : i32, i32
  }
  func.func @transform_5(%arg0: i32) -> (i32, i32) {
    %c0_i32 = arith.constant 0 : i32
    %c0_i32_0 = arith.constant 0 : i32
    return %arg0, %c0_i32 : i32, i32
  }
}

module attributes {stable_mosaic.version = 11 : i64} {
  func.func @mlp_kernel(%arg0: i32, %arg1: memref<16x32xf32, #tpu.memory_space<vmem>>, %arg2: memref<32x128xbf16, #tpu.memory_space<vmem>>, %arg3: memref<1x128xf32, #tpu.memory_space<vmem>>, %arg4: memref<128x128xbf16, #tpu.memory_space<vmem>>, %arg5: memref<1x128xf32, #tpu.memory_space<vmem>>, %arg6: memref<16x128xbf16, #tpu.memory_space<vmem>>) attributes {dimension_semantics = [#tpu.dimension_semantics<parallel>], iteration_bounds = array<i64: 1>, scalar_prefetch = 0 : i64, scratch_operands = 0 : i64, tpu.core_type = #tpu.core_type<tc>, window_params = [{transform_indices = @transform_0, window_bounds = array<i64: 16, 32>}, {pipeline_mode = #tpu.pipeline_mode<synchronous>, transform_indices = @transform_1, window_bounds = array<i64: 32, 128>}, {pipeline_mode = #tpu.pipeline_mode<synchronous>, transform_indices = @transform_2, window_bounds = array<i64: 1, 128>}, {pipeline_mode = #tpu.pipeline_mode<synchronous>, transform_indices = @transform_3, window_bounds = array<i64: 128, 128>}, {pipeline_mode = #tpu.pipeline_mode<synchronous>, transform_indices = @transform_4, window_bounds = array<i64: 1, 128>}, {transform_indices = @transform_5, window_bounds = array<i64: 16, 128>}]} {
    %c0 = arith.constant 0 : index
    %c0_0 = arith.constant 0 : index
    %0 = vector.load %arg1[%c0, %c0_0] : memref<16x32xf32, #tpu.memory_space<vmem>>, vector<16x32xf32>
    %1 = arith.truncf %0 : vector<16x32xf32> to vector<16x32xbf16>
    %c0_1 = arith.constant 0 : index
    %c0_2 = arith.constant 0 : index
    %2 = vector.load %arg2[%c0_1, %c0_2] : memref<32x128xbf16, #tpu.memory_space<vmem>>, vector<32x128xbf16>
    %cst = arith.constant dense<0.000000e+00> : vector<16x128xf32>
    %3 = tpu.matmul %1, %2, %cst {dimension_numbers = #tpu.dot_dimension_numbers<[1], [0], [0], [1], [0, 0, 1, 1], [], []>} : vector<16x32xbf16>, vector<32x128xbf16>, vector<16x128xf32> -> vector<16x128xf32>
    %c0_3 = arith.constant 0 : index
    %c0_4 = arith.constant 0 : index
    %4 = vector.load %arg3[%c0_3, %c0_4] : memref<1x128xf32, #tpu.memory_space<vmem>>, vector<1x128xf32>
    %5 = vector.broadcast %4 : vector<1x128xf32> to vector<16x128xf32>
    %6 = arith.addf %3, %5 : vector<16x128xf32>
    %cst_5 = arith.constant 0.000000e+00 : f32
    %7 = vector.broadcast %cst_5 : f32 to vector<16x128xf32>
    %8 = arith.maximumf %6, %7 : vector<16x128xf32>
    %9 = arith.truncf %8 : vector<16x128xf32> to vector<16x128xbf16>
    %c0_6 = arith.constant 0 : index
    %c0_7 = arith.constant 0 : index
    %10 = vector.load %arg4[%c0_6, %c0_7] : memref<128x128xbf16, #tpu.memory_space<vmem>>, vector<128x128xbf16>
    %cst_8 = arith.constant dense<0.000000e+00> : vector<16x128xf32>
    %11 = tpu.matmul %9, %10, %cst_8 {dimension_numbers = #tpu.dot_dimension_numbers<[1], [0], [0], [1], [0, 0, 1, 1], [], []>} : vector<16x128xbf16>, vector<128x128xbf16>, vector<16x128xf32> -> vector<16x128xf32>
    %c0_9 = arith.constant 0 : index
    %c0_10 = arith.constant 0 : index
    %12 = vector.load %arg5[%c0_9, %c0_10] : memref<1x128xf32, #tpu.memory_space<vmem>>, vector<1x128xf32>
    %13 = vector.broadcast %12 : vector<1x128xf32> to vector<16x128xf32>
    %14 = arith.addf %11, %13 : vector<16x128xf32>
    %15 = arith.truncf %14 : vector<16x128xf32> to vector<16x128xbf16>
    %c0_11 = arith.constant 0 : index
    %c0_12 = arith.constant 0 : index
    %16 = vector.load %arg6[%c0_11, %c0_12] : memref<16x128xbf16, #tpu.memory_space<vmem>>, vector<16x128xbf16>
    tpu.vector_store %arg6[%c0_11, %c0_12], %15 {strides = array<i32>} : memref<16x128xbf16, #tpu.memory_space<vmem>>, vector<16x128xbf16>,
    return
  }
  func.func @transform_0(%arg0: i32) -> (i32, i32) {
    %c0_i32 = arith.constant 0 : i32
    %c0_i32_0 = arith.constant 0 : i32
    return %arg0, %c0_i32 : i32, i32
  }
  func.func @transform_1(%arg0: i32) -> (i32, i32) {
    %c0_i32 = arith.constant 0 : i32
    %c0_i32_0 = arith.constant 0 : i32
    %c0_i32_1 = arith.constant 0 : i32
    return %c0_i32, %c0_i32_0 : i32, i32
  }
  func.func @transform_2(%arg0: i32) -> (i32, i32) {
    %c0_i32 = arith.constant 0 : i32
    %c0_i32_0 = arith.constant 0 : i32
    %c0_i32_1 = arith.constant 0 : i32
    return %c0_i32, %c0_i32_0 : i32, i32
  }
  func.func @transform_3(%arg0: i32) -> (i32, i32) {
    %c0_i32 = arith.constant 0 : i32
    %c0_i32_0 = arith.constant 0 : i32
    %c0_i32_1 = arith.constant 0 : i32
    return %c0_i32, %c0_i32_0 : i32, i32
  }
  func.func @transform_4(%arg0: i32) -> (i32, i32) {
    %c0_i32 = arith.constant 0 : i32
    %c0_i32_0 = arith.constant 0 : i32
    %c0_i32_1 = arith.constant 0 : i32
    return %c0_i32, %c0_i32_0 : i32, i32
  }
  func.func @transform_5(%arg0: i32) -> (i32, i32) {
    %c0_i32 = arith.constant 0 : i32
    %c0_i32_0 = arith.constant 0 : i32
    return %arg0, %c0_i32 : i32, i32
  }
}

</mosaic_0001>

<bundles_post_ra>
// kernel: mlp_forward.1
= control target key start
LH: loop header
LB: loop body
LE: loop exit
PB: predicated region body
PF: predicated region fallthrough
CT: control target
= control target key end

     0   :  { %10 = vsyncpa [#allocation3], 0  ;;  %s337_s18 = smov [#allocation2]   ;;  %s405_s0 = inlined_call_operand.vmem [shape: f32[16,32], index: 0, kind: input, shape index: {}]   ;;  %s406_s1 = inlined_call_operand.vmem [shape: bf16[32,128], index: 1, kind: input, shape index: {}]   ;;  %s407_s2 = inlined_call_operand.vmem [shape: f32[1,128], index: 2, kind: input, shape index: {}]   ;;  %s408_s3 = inlined_call_operand.hbm [shape: bf16[128,128], index: 3, kind: input, shape index: {}]   ;;  %s409_s4 = inlined_call_operand.vmem [shape: f32[1,128], index: 4, kind: input, shape index: {}]   ;;  %s410_s5 = inlined_call_operand.vmem [shape: bf16[16,128], index: 5, kind: output, shape index: {}]  }
   0x1   :  { %s22_s19 = sshll.u32 %s337_s18, 4  ;;  %s313_s22 = scalar_lea.hbm %s408_s3, 1024  ;;  %s23_s19 = int_to_ptr.vmem [resolvable:$true] %s22_s19 }
   0x2   :  { %p314_p0 = scmp.ne.s32.totalorder %s408_s3, %s313_s22  ;;  %p317_p1 = scmp.lt.u32.totalorder %s313_s22, %s408_s3 }
   0x4   :  { %p319_p2 = pnand %p317_p1, %p314_p0 }
   0x6   :  { %322 = shalt.err (!%p319_p2)
}
   0x7   :  { %s323_s27 = scalar_lea.vmem %s23_s19, 1024  ;;  %p328_p4 = scmp.lt.s32.totalorder %s23_s19, %s23_s19 }
   0x8   :  { %p324_p3 = scmp.ne.s32.totalorder %s23_s19, %s323_s27  ;;  %p329_p5 = scmp.lt.s32.totalorder %s323_s27, %s323_s27 }
   0xa   :  { %p330_p6 = por %p329_p5, %p328_p4 }
   0xc   :  { %p331_p7 = pnand %p330_p6, %p324_p3 }
   0xe   :  { %334 = shalt.err (!%p331_p7)
}
   0xf   :  { %s338_s28 = smov 64   ;;  %s339_s29 = smov 4  }
  0x10   :  { %28 = dma.hbm_to_vmem [thread:$0]  %s408_s3, 1024, %s23_s19, [#allocation3], %s338_s28, %s338_s28, %s339_s29  }
  0x11   :  { %335 = dma.done.wait [#allocation3], 1024  }
  0x12   :  { %336 = vsyncadd [#allocation3], 4294966272  ;;  %v340_v0 = vmov 0.0   ;;  %vm341_vm0 = vmmov 0   ;;  %v303_v1 = vld [vmem:[%s406_s1] sm:$0xff]   ;;  %v304_v2 = vld [vmem:[%s406_s1 + $0x8] sm:$0xff]  }
  0x13   :  { %270 = vmatprep.subr.bf16.mxu0 %v340_v0  ;;  %274 = vmatprep.mubr.msk.bf16.mxu0 %vm341_vm0, %v340_v0  ;;  %v35_v3 = vld [vmem:[%s405_s0] sm:$0xff]  ;;  %v36_v4 = vld [vmem:[%s405_s0 + $0x8] sm:$0xff]  ;;  %v305_v5 = vld [vmem:[#allocation2] sm:$0xff]   ;;  %vm61_vm1 = vcmask 261120  }
  0x14   :  { %278 = vmatprep.subr.bf16.mxu1 %v340_v0  ;;  %294 = vmatprep.mubr.msk.bf16.mxu1 %vm341_vm0, %v340_v0  ;;  %v37_v6 = vpack.c.bf16 %v36_v4, %v35_v3  ;;  %v306_v7 = vld [vmem:[#allocation2 + $0x8] sm:$0xff]   ;;  %v307_v8 = vld [vmem:[#allocation2 + $0x10] sm:$0xff]   ;;  %v308_v9 = vld [vmem:[#allocation2 + $0x18] sm:$0xff]  }
  0x15   :  { %271 = vmatpush3.bf16.msra.mxu0 %v303_v1  ;;  %279 = vmatpush3.bf16.msra.mxu1 %v305_v5  ;;  %v309_v10 = vld [vmem:[#allocation2 + $0x20] sm:$0xff]   ;;  %v310_v11 = vld [vmem:[#allocation2 + $0x28] sm:$0xff]   ;;  %v311_v12 = vld [vmem:[#allocation2 + $0x30] sm:$0xff]  }
  0x16   :  { %272 = vmatprep.subr.bf16.mxu0 %v340_v0  ;;  %280 = vmatprep.subr.bf16.mxu1 %v340_v0  ;;  %v312_v13 = vld [vmem:[#allocation2 + $0x38] sm:$0xff]   ;;  %v236_v14 = vld [vmem:[%s407_s2] ss:$0 sm:$0xff] }
  0x17   :  { %v240_v24 = vld [vmem:[%s409_s4] ss:$0 sm:$0xff] }
  0x19   :  { %273 = vmatpush3.bf16.msra.mxu0 %v304_v2  ;;  %281 = vmatpush3.bf16.msra.mxu1 %v306_v7 }
  0x1a   :  { %282 = vmatprep.subr.bf16.mxu1 %v340_v0 }
  0x1c   :  { %275 = vmatmul.mubr.msk.bf16.vlgmr.msra.gmra.mrb[0].mxu0 %vm61_vm1, %v37_v6 }
  0x1d   :  { %283 = vmatpush3.bf16.msra.mxu1 %v307_v8 }
  0x1e   :  { %284 = vmatprep.subr.bf16.mxu1 %v340_v0 }
  0x21   :  { %285 = vmatpush3.bf16.msra.mxu1 %v308_v9 }
  0x22   :  { %286 = vmatprep.subr.bf16.mxu1 %v340_v0 }
  0x25   :  { %287 = vmatpush3.bf16.msra.mxu1 %v309_v10 }
  0x26   :  { %288 = vmatprep.subr.bf16.mxu1 %v340_v0 }
  0x29   :  { %289 = vmatpush3.bf16.msra.mxu1 %v310_v11 }
  0x2a   :  { %290 = vmatprep.subr.bf16.mxu1 %v340_v0 }
  0x2d   :  { %291 = vmatpush3.bf16.msra.mxu1 %v311_v12 }
  0x2e   :  { %292 = vmatprep.subr.bf16.mxu1 %v340_v0 }
  0x31   :  { %293 = vmatpush3.bf16.msra.mxu1 %v312_v13 }
  0xef   :  { %v99_v15 = vpop.f32.mrb[0].mxu0 }
  0xf0   :  { %v100_v16 = vadd.f32 %v236_v14, %v99_v15  ;;  %v276_v17 = vpop.f32.mrb[1].mxu0 }
  0xf1   :  { %v102_v18 = vpop.f32.mrb[2].mxu0 }
  0xf2   :  { %v103_v19 = vadd.f32 %v236_v14, %v102_v18  ;;  %v277_v20 = vpop.f32.mrb[3].mxu0  ;;  %v106_v21 = vmax.f32 %v100_v16, 0.0 }
  0xf4   :  { %v107_v22 = vmax.f32 %v103_v19, 0.0 }
  0xf6   :  { %v108_v23 = vpack.c.bf16 %v107_v22, %v106_v21 }
  0xf8   :  { %295 = vmatmul.mubr.bf16.vlgmr.msra.gmra.mrb[0].mxu1 %v108_v23 }
 0x1cb   :  { %v214_v25 = vpop.f32.mrb[0].mxu1 }
 0x1cc   :  { %v296_v26 = vpop.f32.mrb[1].mxu1  ;;  %v215_v28 = vadd.f32 %v240_v24, %v214_v25 }
 0x1cd   :  { %v217_v27 = vpop.f32.mrb[2].mxu1 }
 0x1ce   :  { %v218_v29 = vadd.f32 %v240_v24, %v217_v27  ;;  %v297_v30 = vpop.f32.mrb[3].mxu1 }
 0x1d0   :  { %v256_v31 = vpack.c.bf16 %v218_v29, %v215_v28 }
 0x1d2   :  { %257 = vst [vmem:[%s410_s5] sm:$0xff] %v256_v31  }
 0x1d3   :  { %235 = vsyncpa [#allocation3], 1 }

// kernel: mlp_forward.1
= control target key start
LH: loop header
LB: loop body
LE: loop exit
PB: predicated region body
PF: predicated region fallthrough
CT: control target
= control target key end

     0   :  { %10 = vsyncpa [#allocation3], 0  ;;  %s337_s18 = smov [#allocation2]   ;;  %s405_s0 = inlined_call_operand.vmem [shape: f32[16,32], index: 0, kind: input, shape index: {}]   ;;  %s406_s1 = inlined_call_operand.vmem [shape: bf16[32,128], index: 1, kind: input, shape index: {}]   ;;  %s407_s2 = inlined_call_operand.vmem [shape: f32[1,128], index: 2, kind: input, shape index: {}]   ;;  %s408_s3 = inlined_call_operand.hbm [shape: bf16[128,128], index: 3, kind: input, shape index: {}]   ;;  %s409_s4 = inlined_call_operand.vmem [shape: f32[1,128], index: 4, kind: input, shape index: {}]   ;;  %s410_s5 = inlined_call_operand.vmem [shape: bf16[16,128], index: 5, kind: output, shape index: {}]  }
   0x1   :  { %s22_s19 = sshll.u32 %s337_s18, 4  ;;  %s313_s22 = scalar_lea.hbm %s408_s3, 1024  ;;  %s23_s19 = int_to_ptr.vmem [resolvable:$true] %s22_s19 }
   0x2   :  { %p314_p0 = scmp.ne.s32.totalorder %s408_s3, %s313_s22  ;;  %p317_p1 = scmp.lt.u32.totalorder %s313_s22, %s408_s3 }
   0x4   :  { %p319_p2 = pnand %p317_p1, %p314_p0 }
   0x6   :  { %322 = shalt.err (!%p319_p2)
}
   0x7   :  { %s323_s27 = scalar_lea.vmem %s23_s19, 1024  ;;  %p328_p4 = scmp.lt.s32.totalorder %s23_s19, %s23_s19 }
   0x8   :  { %p324_p3 = scmp.ne.s32.totalorder %s23_s19, %s323_s27  ;;  %p329_p5 = scmp.lt.s32.totalorder %s323_s27, %s323_s27 }
   0xa   :  { %p330_p6 = por %p329_p5, %p328_p4 }
   0xc   :  { %p331_p7 = pnand %p330_p6, %p324_p3 }
   0xe   :  { %334 = shalt.err (!%p331_p7)
}
   0xf   :  { %s338_s28 = smov 64   ;;  %s339_s29 = smov 4  }
  0x10   :  { %28 = dma.hbm_to_vmem [thread:$0]  %s408_s3, 1024, %s23_s19, [#allocation3], %s338_s28, %s338_s28, %s339_s29  }
  0x11   :  { %335 = dma.done.wait [#allocation3], 1024  }
  0x12   :  { %336 = vsyncadd [#allocation3], 4294966272  ;;  %v340_v0 = vmov 0.0   ;;  %vm341_vm0 = vmmov 0   ;;  %v303_v1 = vld [vmem:[%s406_s1] sm:$0xff]   ;;  %v304_v2 = vld [vmem:[%s406_s1 + $0x8] sm:$0xff]  }
  0x13   :  { %270 = vmatprep.subr.bf16.mxu0 %v340_v0  ;;  %274 = vmatprep.mubr.msk.bf16.mxu0 %vm341_vm0, %v340_v0  ;;  %v35_v3 = vld [vmem:[%s405_s0] sm:$0xff]  ;;  %v36_v4 = vld [vmem:[%s405_s0 + $0x8] sm:$0xff]  ;;  %v305_v5 = vld [vmem:[#allocation2] sm:$0xff]   ;;  %vm61_vm1 = vcmask 261120  }
  0x14   :  { %278 = vmatprep.subr.bf16.mxu1 %v340_v0  ;;  %294 = vmatprep.mubr.msk.bf16.mxu1 %vm341_vm0, %v340_v0  ;;  %v37_v6 = vpack.c.bf16 %v36_v4, %v35_v3  ;;  %v306_v7 = vld [vmem:[#allocation2 + $0x8] sm:$0xff]   ;;  %v307_v8 = vld [vmem:[#allocation2 + $0x10] sm:$0xff]   ;;  %v308_v9 = vld [vmem:[#allocation2 + $0x18] sm:$0xff]  }
  0x15   :  { %271 = vmatpush3.bf16.msra.mxu0 %v303_v1  ;;  %279 = vmatpush3.bf16.msra.mxu1 %v305_v5  ;;  %v309_v10 = vld [vmem:[#allocation2 + $0x20] sm:$0xff]   ;;  %v310_v11 = vld [vmem:[#allocation2 + $0x28] sm:$0xff]   ;;  %v311_v12 = vld [vmem:[#allocation2 + $0x30] sm:$0xff]  }
  0x16   :  { %272 = vmatprep.subr.bf16.mxu0 %v340_v0  ;;  %280 = vmatprep.subr.bf16.mxu1 %v340_v0  ;;  %v312_v13 = vld [vmem:[#allocation2 + $0x38] sm:$0xff]   ;;  %v236_v14 = vld [vmem:[%s407_s2] ss:$0 sm:$0xff] }
  0x17   :  { %v240_v24 = vld [vmem:[%s409_s4] ss:$0 sm:$0xff] }
  0x19   :  { %273 = vmatpush3.bf16.msra.mxu0 %v304_v2  ;;  %281 = vmatpush3.bf16.msra.mxu1 %v306_v7 }
  0x1a   :  { %282 = vmatprep.subr.bf16.mxu1 %v340_v0 }
  0x1c   :  { %275 = vmatmul.mubr.msk.bf16.vlgmr.msra.gmra.mrb[0].mxu0 %vm61_vm1, %v37_v6 }
  0x1d   :  { %283 = vmatpush3.bf16.msra.mxu1 %v307_v8 }
  0x1e   :  { %284 = vmatprep.subr.bf16.mxu1 %v340_v0 }
  0x21   :  { %285 = vmatpush3.bf16.msra.mxu1 %v308_v9 }
  0x22   :  { %286 = vmatprep.subr.bf16.mxu1 %v340_v0 }
  0x25   :  { %287 = vmatpush3.bf16.msra.mxu1 %v309_v10 }
  0x26   :  { %288 = vmatprep.subr.bf16.mxu1 %v340_v0 }
  0x29   :  { %289 = vmatpush3.bf16.msra.mxu1 %v310_v11 }
  0x2a   :  { %290 = vmatprep.subr.bf16.mxu1 %v340_v0 }
  0x2d   :  { %291 = vmatpush3.bf16.msra.mxu1 %v311_v12 }
  0x2e   :  { %292 = vmatprep.subr.bf16.mxu1 %v340_v0 }
  0x31   :  { %293 = vmatpush3.bf16.msra.mxu1 %v312_v13 }
  0xef   :  { %v99_v15 = vpop.f32.mrb[0].mxu0 }
  0xf0   :  { %v100_v16 = vadd.f32 %v236_v14, %v99_v15  ;;  %v276_v17 = vpop.f32.mrb[1].mxu0 }
  0xf1   :  { %v102_v18 = vpop.f32.mrb[2].mxu0 }
  0xf2   :  { %v103_v19 = vadd.f32 %v236_v14, %v102_v18  ;;  %v277_v20 = vpop.f32.mrb[3].mxu0  ;;  %v106_v21 = vmax.f32 %v100_v16, 0.0 }
  0xf4   :  { %v107_v22 = vmax.f32 %v103_v19, 0.0 }
  0xf6   :  { %v108_v23 = vpack.c.bf16 %v107_v22, %v106_v21 }
  0xf8   :  { %295 = vmatmul.mubr.bf16.vlgmr.msra.gmra.mrb[0].mxu1 %v108_v23 }
 0x1cb   :  { %v214_v25 = vpop.f32.mrb[0].mxu1 }
 0x1cc   :  { %v296_v26 = vpop.f32.mrb[1].mxu1  ;;  %v215_v28 = vadd.f32 %v240_v24, %v214_v25 }
 0x1cd   :  { %v217_v27 = vpop.f32.mrb[2].mxu1 }
 0x1ce   :  { %v218_v29 = vadd.f32 %v240_v24, %v217_v27  ;;  %v297_v30 = vpop.f32.mrb[3].mxu1 }
 0x1d0   :  { %v256_v31 = vpack.c.bf16 %v218_v29, %v215_v28 }
 0x1d2   :  { %257 = vst [vmem:[%s410_s5] sm:$0xff] %v256_v31  }
 0x1d3   :  { %235 = vsyncpa [#allocation3], 1 }

</bundles_post_ra>
